<compile_context>
chip_gen: v6e
topology: v6e:2x2x1
jax: 0.10.0
libtpu: 0.0.40
codegen_flags: <defaults>
</compile_context>

<pallas_src>
import functools
import math

import jax
import jax.numpy as jnp
from jax.experimental import pallas as pl
from jax.experimental.pallas import tpu as pltpu


# ---------------------------------------------------------------------------
# Linear kernel:  y = x @ W + b      (used for fc_q / fc_k / fc_v / fc_o)
# ---------------------------------------------------------------------------
def _linear_kernel(x_ref, w_ref, b_ref, o_ref):
    acc = jnp.dot(x_ref[...], w_ref[...], preferred_element_type=jnp.float32)
    o_ref[...] = (acc + b_ref[...]).astype(o_ref.dtype)


def linear(x2d, w, b, *, block_m=256):
    """x2d: (M, K), w: (K, N), b: (N,) -> (M, N)."""
    M, K = x2d.shape
    N = w.shape[1]
    tm = M if M <= block_m else block_m
    return pl.pallas_call(
        _linear_kernel,
        out_shape=jax.ShapeDtypeStruct((M, N), x2d.dtype),
        grid_spec=pl.GridSpec(
            grid=(pl.cdiv(M, tm),),
            in_specs=[
                pl.BlockSpec((tm, K), lambda i: (i, 0)),
                pl.BlockSpec((K, N), lambda i: (0, 0)),
                pl.BlockSpec((1, N), lambda i: (0, 0)),
            ],
            out_specs=pl.BlockSpec((tm, N), lambda i: (i, 0)),
        ),
        compiler_params=pltpu.CompilerParams(
            dimension_semantics=("parallel",)),
    )(x2d, w, b.reshape(1, N))


# ---------------------------------------------------------------------------
# Fused attention kernel: one (batch, head) tile per grid step.
# ---------------------------------------------------------------------------
def _attention_kernel(*refs, scale_inv, keep_prob, has_mask, apply_dropout):
    idx = 0
    q_ref = refs[idx]; idx += 1          # (1, 1, Sq, D)
    k_ref = refs[idx]; idx += 1          # (1, 1, Sk, D)
    v_ref = refs[idx]; idx += 1          # (1, 1, Sk, D)
    mask_ref = None
    drop_ref = None
    if has_mask:
        mask_ref = refs[idx]; idx += 1   # (1, 1, Sq, Sk) int32
    if apply_dropout:
        drop_ref = refs[idx]; idx += 1   # (1, 1, Sq, Sk) f32 {0,1}
    x_ref = refs[idx]; idx += 1          # (1, 1, Sq, D)
    alpha_ref = refs[idx]                # (1, 1, Sq, Sk)

    q = q_ref[0, 0].astype(jnp.float32)  # (Sq, D)
    k = k_ref[0, 0].astype(jnp.float32)  # (Sk, D)
    v = v_ref[0, 0].astype(jnp.float32)  # (Sk, D)

    # score = Q K^T / sqrt(head_dim)
    score = jnp.dot(q, k.T, preferred_element_type=jnp.float32) * scale_inv
    if has_mask:
        score = jnp.where(mask_ref[0, 0] == 0, jnp.float32(-1e10), score)

    # numerically-stable softmax along the key axis
    score_max = jnp.max(score, axis=-1, keepdims=True)
    e = jnp.exp(score - score_max)
    denom = jnp.sum(e, axis=-1, keepdims=True)
    alpha = e / denom                                       # (Sq, Sk)
    alpha_ref[0, 0] = alpha.astype(alpha_ref.dtype)         # pre-dropout, as in PyTorch

    p = alpha
    if apply_dropout:
        # inverted dropout on the attention weights only (alpha output untouched)
        p = alpha * drop_ref[0, 0] * jnp.float32(1.0 / keep_prob)

    out = jnp.dot(p, v, preferred_element_type=jnp.float32)  # (Sq, D)
    x_ref[0, 0] = out.astype(x_ref.dtype)


def _attention(q4, k4, v4, mask, drop_keep, *, scale_inv, keep_prob):
    """q4/k4/v4: (B, nH, S, D). mask: (B, 1, Sq, Sk) int32 or None.
    drop_keep: (B, nH, Sq, Sk) f32 {0,1} or None."""
    B, nH, Sq, D = q4.shape
    Sk = k4.shape[2]
    has_mask = mask is not None
    apply_dropout = drop_keep is not None

    kernel = functools.partial(
        _attention_kernel, scale_inv=scale_inv, keep_prob=keep_prob,
        has_mask=has_mask, apply_dropout=apply_dropout)

    in_specs = [
        pl.BlockSpec((1, 1, Sq, D), lambda b, h: (b, h, 0, 0)),
        pl.BlockSpec((1, 1, Sk, D), lambda b, h: (b, h, 0, 0)),
        pl.BlockSpec((1, 1, Sk, D), lambda b, h: (b, h, 0, 0)),
    ]
    inputs = [q4, k4, v4]
    if has_mask:
        in_specs.append(pl.BlockSpec((1, 1, Sq, Sk), lambda b, h: (b, 0, 0, 0)))
        inputs.append(mask)
    if apply_dropout:
        in_specs.append(pl.BlockSpec((1, 1, Sq, Sk), lambda b, h: (b, h, 0, 0)))
        inputs.append(drop_keep)

    out_shape = (jax.ShapeDtypeStruct((B, nH, Sq, D), q4.dtype),
                 jax.ShapeDtypeStruct((B, nH, Sq, Sk), jnp.float32))
    out_specs = (pl.BlockSpec((1, 1, Sq, D), lambda b, h: (b, h, 0, 0)),
                 pl.BlockSpec((1, 1, Sq, Sk), lambda b, h: (b, h, 0, 0)))

    return pl.pallas_call(
        kernel,
        out_shape=out_shape,
        grid_spec=pl.GridSpec(grid=(B, nH), in_specs=in_specs,
                              out_specs=out_specs),
        compiler_params=pltpu.CompilerParams(
            dimension_semantics=("parallel", "parallel")),
    )(*inputs)


# ---------------------------------------------------------------------------
# Full module forward.
# ---------------------------------------------------------------------------
def multi_headed_attention_forward(query, key, value, params, mask=None, *,
                                   n_heads, dropout_p=0.1, training=False,
                                   rng_key=None):
    """query/key/value: (B, S, H). Returns (x, alpha)."""
    B, Sq, H = query.shape
    Sk = key.shape[1]
    assert H % n_heads == 0
    head_dim = H // n_heads
    scale_inv = 1.0 / math.sqrt(head_dim)

    # Linear projections (Pallas tiled matmul + bias over flattened rows).
    Q = linear(query.reshape(B * Sq, H), params["wq"], params["bq"]).reshape(B, Sq, H)
    K = linear(key.reshape(B * Sk, H), params["wk"], params["bk"]).reshape(B, Sk, H)
    V = linear(value.reshape(B * Sk, H), params["wv"], params["bv"]).reshape(B, Sk, H)

    # Split heads: (B, S, H) -> (B, n_heads, S, head_dim)
    Q4 = Q.reshape(B, Sq, n_heads, head_dim).transpose(0, 2, 1, 3)
    K4 = K.reshape(B, Sk, n_heads, head_dim).transpose(0, 2, 1, 3)
    V4 = V.reshape(B, Sk, n_heads, head_dim).transpose(0, 2, 1, 3)

    mask_b = None
    if mask is not None:
        mask_b = jnp.broadcast_to(mask, (B, 1, Sq, Sk)).astype(jnp.int32)

    keep_prob = 1.0 - float(dropout_p)
    drop_keep = None
    if training and dropout_p > 0.0:
        # TODO(synk): on real TPU this could use in-kernel pltpu.prng_random_bits
        # to avoid streaming the keep-mask over HBM; generated host-side here for
        # interpret/CPU portability and determinism.
        if rng_key is None:
            rng_key = jax.random.PRNGKey(0)
        drop_keep = jax.random.bernoulli(
            rng_key, keep_prob, (B, n_heads, Sq, Sk)).astype(jnp.float32)

    x4, alpha = _attention(Q4, K4, V4, mask_b, drop_keep,
                           scale_inv=scale_inv, keep_prob=keep_prob)

    # Merge heads: (B, n_heads, Sq, D) -> (B, Sq, H), then fc_o.
    x = x4.transpose(0, 2, 1, 3).reshape(B, Sq, H)
    x = linear(x.reshape(B * Sq, H), params["wo"], params["bo"]).reshape(B, Sq, H)
    return x, alpha


# ---------------------------------------------------------------------------
# Pure-JAX reference (eval mode) for correctness checking.
# ---------------------------------------------------------------------------
def mha_reference(query, key, value, params, mask, n_heads):
    B, Sq, H = query.shape
    Sk = key.shape[1]
    D = H // n_heads
    Q = query @ params["wq"] + params["bq"]
    K = key @ params["wk"] + params["bk"]
    V = value @ params["wv"] + params["bv"]
    Q = Q.reshape(B, Sq, n_heads, D).transpose(0, 2, 1, 3)
    K = K.reshape(B, Sk, n_heads, D).transpose(0, 2, 1, 3)
    V = V.reshape(B, Sk, n_heads, D).transpose(0, 2, 1, 3)
    score = jnp.einsum("bhqd,bhkd->bhqk", Q, K) / math.sqrt(D)
    if mask is not None:
        score = jnp.where(mask == 0, -1e10, score)
    alpha = jax.nn.softmax(score, axis=-1)
    x = jnp.einsum("bhqk,bhkd->bhqd", alpha, V)
    x = x.transpose(0, 2, 1, 3).reshape(B, Sq, H)
    x = x @ params["wo"] + params["bo"]
    return x, alpha


if __name__ == "__main__":
    B, S, H, NH = 2, 8, 32, 4

    key0 = jax.random.PRNGKey(0)
    keys = jax.random.split(key0, 12)
    sc = 0.05
    params = {
        "wq": sc * jax.random.normal(keys[0], (H, H), jnp.float32),
        "bq": sc * jax.random.normal(keys[1], (H,), jnp.float32),
        "wk": sc * jax.random.normal(keys[2], (H, H), jnp.float32),
        "bk": sc * jax.random.normal(keys[3], (H,), jnp.float32),
        "wv": sc * jax.random.normal(keys[4], (H, H), jnp.float32),
        "bv": sc * jax.random.normal(keys[5], (H,), jnp.float32),
        "wo": sc * jax.random.normal(keys[6], (H, H), jnp.float32),
        "bo": sc * jax.random.normal(keys[7], (H,), jnp.float32),
    }
    q = jax.random.normal(keys[8], (B, S, H), jnp.float32)
    k = jax.random.normal(keys[9], (B, S, H), jnp.float32)
    v = jax.random.normal(keys[10], (B, S, H), jnp.float32)

    # Padding-style mask: hide the last 2 key positions of batch element 1.
    mask = jnp.ones((B, 1, 1, S), jnp.int32)
    mask = mask.at[1, :, :, S - 2:].set(0)

    # Eval-mode forward (dropout identity) -> check against pure-JAX reference.
    x, alpha = multi_headed_attention_forward(
        q, k, v, params, mask, n_heads=NH, dropout_p=0.1, training=False)
    x = jax.block_until_ready(x)
    alpha = jax.block_until_ready(alpha)

    x_ref, a_ref = mha_reference(q, k, v, params, mask, NH)
    assert x.shape == (B, S, H) and alpha.shape == (B, NH, S, S)
    assert jnp.allclose(x, x_ref, atol=1e-4, rtol=1e-4), "x mismatch vs reference"
    assert jnp.allclose(alpha, a_ref, atol=1e-5, rtol=1e-4), "alpha mismatch vs reference"

    # Exercise the training path (dropout on attention weights) once.
    x_tr, alpha_tr = multi_headed_attention_forward(
        q, k, v, params, mask, n_heads=NH, dropout_p=0.1, training=True,
        rng_key=jax.random.PRNGKey(42))
    x_tr = jax.block_until_ready(x_tr)
    assert x_tr.shape == (B, S, H)
    # alpha is pre-dropout -> identical to eval-mode alpha.
    assert jnp.allclose(alpha_tr, alpha, atol=1e-6)

    print("KERNEL_OK")
</pallas_src>

<mosaic_0001>
module attributes {stable_mosaic.version = 11 : i64} {
  func.func @_linear_kernel(%arg0: i32, %arg1: memref<16x32xf32, #tpu.memory_space<vmem>>, %arg2: memref<32x32xf32, #tpu.memory_space<vmem>>, %arg3: memref<1x32xf32, #tpu.memory_space<vmem>>, %arg4: memref<16x32xf32, #tpu.memory_space<vmem>>) attributes {dimension_semantics = [#tpu.dimension_semantics<parallel>], iteration_bounds = array<i64: 1>, scalar_prefetch = 0 : i64, scratch_operands = 0 : i64, tpu.core_type = #tpu.core_type<tc>, window_params = [{transform_indices = @transform_0, window_bounds = array<i64: 16, 32>}, {pipeline_mode = #tpu.pipeline_mode<synchronous>, transform_indices = @transform_1, window_bounds = array<i64: 32, 32>}, {pipeline_mode = #tpu.pipeline_mode<synchronous>, transform_indices = @transform_2, window_bounds = array<i64: 1, 32>}, {transform_indices = @transform_3, window_bounds = array<i64: 16, 32>}]} {
    %c0 = arith.constant 0 : index
    %c0_0 = arith.constant 0 : index
    %0 = vector.load %arg1[%c0, %c0_0] : memref<16x32xf32, #tpu.memory_space<vmem>>, vector<16x32xf32>
    %c0_1 = arith.constant 0 : index
    %c0_2 = arith.constant 0 : index
    %1 = vector.load %arg2[%c0_1, %c0_2] : memref<32x32xf32, #tpu.memory_space<vmem>>, vector<32x32xf32>
    %cst = arith.constant dense<0.000000e+00> : vector<16x32xf32>
    %2 = tpu.matmul %0, %1, %cst {dimension_numbers = #tpu.dot_dimension_numbers<[1], [0], [0], [1], [0, 0, 1, 1], [], []>} : vector<16x32xf32>, vector<32x32xf32>, vector<16x32xf32> -> vector<16x32xf32>
    %c0_3 = arith.constant 0 : index
    %c0_4 = arith.constant 0 : index
    %3 = vector.load %arg3[%c0_3, %c0_4] : memref<1x32xf32, #tpu.memory_space<vmem>>, vector<1x32xf32>
    %4 = vector.broadcast %3 : vector<1x32xf32> to vector<16x32xf32>
    %5 = arith.addf %2, %4 : vector<16x32xf32>
    %c0_5 = arith.constant 0 : index
    %c0_6 = arith.constant 0 : index
    %6 = vector.load %arg4[%c0_5, %c0_6] : memref<16x32xf32, #tpu.memory_space<vmem>>, vector<16x32xf32>
    tpu.vector_store %arg4[%c0_5, %c0_6], %5 {strides = array<i32>} : memref<16x32xf32, #tpu.memory_space<vmem>>, vector<16x32xf32>,
    return
  }
  func.func @transform_0(%arg0: i32) -> (i32, i32) {
    %c0_i32 = arith.constant 0 : i32
    %c0_i32_0 = arith.constant 0 : i32
    return %arg0, %c0_i32 : i32, i32
  }
  func.func @transform_1(%arg0: i32) -> (i32, i32) {
    %c0_i32 = arith.constant 0 : i32
    %c0_i32_0 = arith.constant 0 : i32
    %c0_i32_1 = arith.constant 0 : i32
    return %c0_i32, %c0_i32_0 : i32, i32
  }
  func.func @transform_2(%arg0: i32) -> (i32, i32) {
    %c0_i32 = arith.constant 0 : i32
    %c0_i32_0 = arith.constant 0 : i32
    %c0_i32_1 = arith.constant 0 : i32
    return %c0_i32, %c0_i32_0 : i32, i32
  }
  func.func @transform_3(%arg0: i32) -> (i32, i32) {
    %c0_i32 = arith.constant 0 : i32
    %c0_i32_0 = arith.constant 0 : i32
    return %arg0, %c0_i32 : i32, i32
  }
}

</mosaic_0001>

<bundles_post_ra>
// kernel: tpu_custom_call.1
= control target key start
LH: loop header
LB: loop body
LE: loop exit
PB: predicated region body
PF: predicated region fallthrough
CT: control target
= control target key end

     0   :  { %8 = vsyncpa [#allocation3], 0  ;;  %s299_s0 = inlined_call_operand.hbm [shape: f32[16,32], index: 0, kind: input, shape index: {}]   ;;  %s300_s1 = inlined_call_operand.hbm [shape: f32[32,32], index: 1, kind: input, shape index: {}]   ;;  %s301_s2 = inlined_call_operand.vmem [shape: f32[1,32], index: 2, kind: input, shape index: {}]   ;;  %s302_s3 = inlined_call_operand.hbm [shape: f32[16,32], index: 3, kind: output, shape index: {}]  }
   0x1   :  { %9 = vsyncpa [#allocation6], 0 }
   0x2   :  { %10 = vsyncpa [#allocation4], 0  ;;  %s249_s12 = smov [#allocation2]  }
   0x3   :  { %s16_s13 = sshll.u32 %s249_s12, 4  ;;  %s17_s13 = int_to_ptr.vmem [resolvable:$true] %s16_s13 }
   0x4   :  { %s191_s14 = scalar_lea.vmem %s17_s13, 256  ;;  %p196_p1 = scmp.lt.s32.totalorder %s17_s13, %s17_s13 }
   0x5   :  { %p192_p0 = scmp.ne.s32.totalorder %s17_s13, %s191_s14  ;;  %p197_p2 = scmp.lt.s32.totalorder %s191_s14, %s191_s14 }
   0x7   :  { %p198_p3 = por %p197_p2, %p196_p1 }
   0x9   :  { %p199_p4 = pnand %p198_p3, %p192_p0 }
   0xb   :  { %202 = shalt.err (!%p199_p4)
}
   0xc   :  { %s250_s15 = smov 128   ;;  %s251_s16 = smov 8  }
   0xd   :  { %22 = dma.hbm_to_vmem [thread:$0]  %s299_s0, 256, %s17_s13, [#allocation3], %s250_s15, %s250_s15, %s251_s16  }
   0xe   :  { %s252_s19 = smov [#allocation5]  }
   0xf   :  { %s28_s20 = sshll.u32 %s252_s19, 4  ;;  %s29_s20 = int_to_ptr.vmem [resolvable:$true] %s28_s20 }
  0x10   :  { %s211_s21 = scalar_lea.vmem %s29_s20, 512  ;;  %p216_p6 = scmp.lt.s32.totalorder %s29_s20, %s29_s20 }
  0x11   :  { %p212_p5 = scmp.ne.s32.totalorder %s29_s20, %s211_s21  ;;  %p217_p7 = scmp.lt.s32.totalorder %s211_s21, %s211_s21 }
  0x13   :  { %p218_p8 = por %p217_p7, %p216_p6 }
  0x15   :  { %p219_p9 = pnand %p218_p8, %p212_p5 }
  0x17   :  { %222 = shalt.err (!%p219_p9)
}
  0x18   :  { %34 = dma.hbm_to_vmem [thread:$0]  %s300_s1, 512, %s29_s20, [#allocation6], %s250_s15, %s250_s15, %s251_s16  }
  0x19   :  { %243 = dma.done.wait [#allocation3], 256  }
  0x1a   :  { %244 = vsyncadd [#allocation3], 4294967040 }
  0x1b   :  { %245 = dma.done.wait [#allocation6], 512  }
  0x1c   :  { %246 = vsyncadd [#allocation6], 4294966784  ;;  %vm56_vm0 = vcmask 261120   ;;  %v48_v0 = vld [vmem:[#allocation5 + $0x18] sm:$0xff]  ;;  %v47_v1 = vld [vmem:[#allocation5 + $0x10] sm:$0xff]  ;;  %s253_s24 = smov [#allocation7]  }
  0x1d   :  { %167 = vmatprep.subr.mxu0 %v48_v0  ;;  %v43_v2 = vld [vmem:[#allocation2] sm:$0xff]  ;;  %v46_v3 = vld [vmem:[#allocation5 + $0x8] sm:$0xff]  ;;  %v45_v4 = vld [vmem:[#allocation5] sm:$0xff]  ;;  %s145_s25 = sshll.u32 %s253_s24, 4  ;;  %s146_s25 = int_to_ptr.vmem [resolvable:$true] %s145_s25 }
  0x1e   :  { %168 = vmatpush3.msra.mxu0 %v48_v0  ;;  %175 = vmatprep.mubr.msk.f32.mxu0 %vm56_vm0, %v43_v2  ;;  %v44_v5 = vld [vmem:[#allocation2 + $0x8] sm:$0xff]  ;;  %v158_v6 = vld [vmem:[%s301_s2] ss:$0 sm:$0xff]  ;;  %s223_s26 = scalar_lea.vmem %s146_s25, 256  ;;  %p228_p11 = scmp.lt.s32.totalorder %s146_s25, %s146_s25 }
  0x1f   :  { %169 = vmatprep.subr.mxu0 %v47_v1  ;;  %p224_p10 = scmp.ne.s32.totalorder %s146_s25, %s223_s26  ;;  %p229_p12 = scmp.lt.s32.totalorder %s223_s26, %s223_s26 }
  0x20   :  { %170 = vmatpush3.msra.mxu0 %v47_v1 }
  0x21   :  { %171 = vmatprep.subr.mxu0 %v46_v3  ;;  %p230_p13 = por %p229_p12, %p228_p11 }
  0x22   :  { %172 = vmatpush3.msra.mxu0 %v46_v3 }
  0x23   :  { %173 = vmatprep.subr.mxu0 %v45_v4  ;;  %p231_p0 = pnand %p230_p13, %p224_p10 }
  0x24   :  { %174 = vmatpush3.msra.mxu0 %v45_v4 }
  0x25   :  { %176 = vmatmul.mubr.msk.f32.vlgmr.msra.gmra.mxu0 %vm56_vm0, %v44_v5 }
  0xe5   :  { %v177_v7 = vpop.f32.mrf.mxu0 }
  0xe6   :  { %v135_v8 = vadd.f32 %v177_v7, %v158_v6 }
  0xe7   :  { %v129_v9 = vpop.f32.mrf.mxu0 }
  0xe8   :  { %139 = vst.msk [vmem:[#allocation7 + $0x8] sm:$0xff] %vm56_vm0, %v135_v8  ;;  %v130_v10 = vadd.f32 %v158_v6, %v129_v9 }
  0xea   :  { %138 = vst.msk [vmem:[#allocation7] sm:$0xff] %vm56_vm0, %v130_v10 }
  0xeb   :  { %234 = shalt.err (!%p231_p0)
}
  0xec   :  { %151 = dma.vmem_to_hbm [thread:$0]  %s146_s25, 256, %s302_s3, [#allocation4], %s250_s15, %s250_s15, %s251_s16  }
  0xed   :  { %247 = dma.done.wait [#allocation4], 256  }
  0xee   :  { %248 = vsyncadd [#allocation4], 4294967040 }
  0xef   :  { %155 = vsyncpa [#allocation3], 1 }
  0xf0   :  { %156 = vsyncpa [#allocation6], 1 }
  0xf1   :  { %157 = vsyncpa [#allocation4], 1 }

</bundles_post_ra>
